<compile_context>
chip_gen: v6e
topology: v6e:2x2x1
jax: 0.10.0
libtpu: 0.0.40
codegen_flags: <defaults>
</compile_context>

<pallas_src>
import jax
import jax.numpy as jnp
from jax.experimental import pallas as pl
from jax.experimental.pallas import tpu as pltpu

BN_EPS = 1e-5

# Set to jnp.bfloat16 to halve the pass-1-write / pass-2-read HBM traffic (~12-15% wall
# clock on an HBM-bound kernel) at the cost of ~1e-3 relative error on the output.
_Y_DTYPE = jnp.float32


def _choose_hw_tile(hw, n_batch, c, vmem_budget_bytes=12 * 1024 * 1024, min_parallel=2):
    """Pick the lane-tile width for the H*W axis.

    Largest multiple of 128 that divides hw (or hw itself), subject to
      * working set per pass-1 grid step ~ 5 * c * hw_tile * 4 bytes (2x double-buffered
        x in, 2x double-buffered y out, 1x acc scratch) staying under vmem_budget_bytes,
      * at least `min_parallel` independent (n, hw-tile) grid steps when possible, so a
        2-TensorCore chip (v7x) never has an idle core.
    """
    max_tile = max(128, (vmem_budget_bytes // (5 * c * 4)) // 128 * 128)
    cands = [d for d in range(128, min(hw, max_tile) + 1, 128) if hw % d == 0]
    if hw <= max_tile:
        cands.append(hw)
    if not cands:
        # TODO(synk): no 128-multiple divisor of HW under the VMEM budget; fall back to
        # the full row instead of a cdiv grid + masked tail tile.
        return hw
    for d in sorted(set(cands), reverse=True):
        if n_batch * (hw // d) >= min_parallel:
            return d
    return max(cands)


def _pass1_kernel(x_ref, wcol_ref, y_ref, sum_ref, sumsq_ref, acc_ref):
    # x_ref:    [C, hw_tile]  VMEM  (one (n, hw-tile) slab at time step t)
    # wcol_ref: [C, C, 1]     VMEM  (wcol[ci, co, 0] = conv_w[co, ci] / T)
    # y_ref:    [C, hw_tile]  VMEM  (un-normalized conv output, written at last t)
    # sum_ref / sumsq_ref: [C, 1] VMEM (per-channel partial BN stats for this tile)
    # acc_ref:  [C, hw_tile]  VMEM scratch (time-sum accumulator, persists across t)
    t = pl.program_id(2)

    @pl.when(t == 0)
    def _init():
        acc_ref[...] = jnp.zeros_like(acc_ref)

    acc_ref[...] += x_ref[...]

    @pl.when(t == pl.num_programs(2) - 1)
    def _finalize():
        c = acc_ref.shape[0]
        xm = acc_ref[...]                          # time-sum; 1/T folded into wcol
        # 1x1 conv as C full-tile broadcast FMAs: y = sum_ci w[:, ci] (x) xm[ci, :]
        y = wcol_ref[0] * xm[0:1, :]               # [C,1] * [1,hw] -> [C,hw]
        for ci in range(1, c):
            y = y + wcol_ref[ci] * xm[ci:ci + 1, :]
        y_ref[...] = y.astype(y_ref.dtype)         # single unmasked full-tile store
        sum_ref[...] = jnp.sum(y, axis=1, keepdims=True)
        sumsq_ref[...] = jnp.sum(y * y, axis=1, keepdims=True)


def _affine_kernel(y_ref, scale_ref, shift_ref, o_ref):
    # y_ref/o_ref: [C, hw_tile] VMEM; scale_ref/shift_ref: [C, 1] VMEM.
    y = y_ref[...].astype(jnp.float32)
    o_ref[...] = y * scale_ref[...] + shift_ref[...]   # one broadcast FMA + one store


def transform_forward(x, conv_w, bn_gamma, bn_beta):
    """x: [T, N, C, H, W] f32; conv_w: [C, C, 1, 1]; bn_gamma/bn_beta: [C] -> [N, C, H, W]."""
    T, N, C, H, W = x.shape
    HW = H * W
    hw_tile = _choose_hw_tile(HW, N, C)
    n_hw = HW // hw_tile if HW % hw_tile == 0 else 1
    if HW % hw_tile != 0:
        hw_tile = HW

    x4 = x.reshape(T, N, C, HW)                       # free reshape, stays NCHW-contiguous
    # Fold the time-mean 1/T into the conv weight; pre-shape columns as [C_in, C_out, 1]
    # so each wcol[ci] is a sublane-aligned [C_out, 1] broadcast factor in the kernel.
    w_scaled = conv_w[:, :, 0, 0].astype(jnp.float32) / float(T)   # [C_out, C_in]
    wcols = jnp.transpose(w_scaled)[:, :, None]                    # [C_in, C_out, 1]

    # ---- pass 1: time-sum + 1x1 conv (w/T folded) + per-tile BN partial stats ----------
    y, psum, psumsq = pl.pallas_call(
        _pass1_kernel,
        out_shape=(
            jax.ShapeDtypeStruct((N, C, HW), _Y_DTYPE),
            jax.ShapeDtypeStruct((N, n_hw, C, 1), jnp.float32),
            jax.ShapeDtypeStruct((N, n_hw, C, 1), jnp.float32),
        ),
        grid_spec=pltpu.PrefetchScalarGridSpec(
            num_scalar_prefetch=0,
            grid=(N, n_hw, T),                                     # reduction axis (T) last
            in_specs=[
                pl.BlockSpec((None, None, C, hw_tile), lambda n, j, t: (t, n, 0, j)),
                pl.BlockSpec((C, C, 1), lambda n, j, t: (0, 0, 0)),      # conv weight cols
            ],
            out_specs=(
                pl.BlockSpec((None, C, hw_tile), lambda n, j, t: (n, 0, j)),
                pl.BlockSpec((None, None, C, 1), lambda n, j, t: (n, j, 0, 0)),
                pl.BlockSpec((None, None, C, 1), lambda n, j, t: (n, j, 0, 0)),
            ),
            scratch_shapes=[pltpu.VMEM((C, hw_tile), jnp.float32)],
        ),
        compiler_params=pltpu.CompilerParams(
            dimension_semantics=("parallel", "parallel", "arbitrary"),
        ),
    )(x4, wcols)

    # ---- BN stats finalize + affine fold (size-C math, plain JAX) -----------------------
    # NOTE: E[y^2] - E[y]^2 in f32 can cancel when |mean| >> std; acceptable here.
    count = float(N * HW)
    s = jnp.sum(psum, axis=(0, 1)).reshape(C)
    ss = jnp.sum(psumsq, axis=(0, 1)).reshape(C)
    mu = s / count
    var = ss / count - mu * mu                        # biased variance (training-mode BN)
    scale = (bn_gamma * jax.lax.rsqrt(var + BN_EPS)).astype(jnp.float32).reshape(C, 1)
    shift = (bn_beta.reshape(C, 1) - mu.reshape(C, 1) * scale).astype(jnp.float32)

    # ---- pass 2: apply folded per-channel affine, in place over y -----------------------
    alias = {0: 0} if _Y_DTYPE == jnp.float32 else {}
    out = pl.pallas_call(
        _affine_kernel,
        out_shape=jax.ShapeDtypeStruct((N, C, HW), jnp.float32),
        grid_spec=pltpu.PrefetchScalarGridSpec(
            num_scalar_prefetch=0,
            grid=(N, n_hw),
            in_specs=[
                pl.BlockSpec((None, C, hw_tile), lambda n, j: (n, 0, j)),
                pl.BlockSpec((C, 1), lambda n, j: (0, 0)),        # scale [C,1]
                pl.BlockSpec((C, 1), lambda n, j: (0, 0)),        # shift [C,1]
            ],
            out_specs=pl.BlockSpec((None, C, hw_tile), lambda n, j: (n, 0, j)),
        ),
        compiler_params=pltpu.CompilerParams(
            dimension_semantics=("parallel", "parallel"),
        ),
        input_output_aliases=alias,
    )(y, scale, shift)

    return out.reshape(N, C, H, W)


if __name__ == "__main__":
    key = jax.random.PRNGKey(0)
    k_x, k_w = jax.random.split(key)

    # Small shapes consistent with the module: time steps T, NCHW frames.
    T, N, C, H, W = 4, 2, 4, 16, 16

    x = jax.random.normal(k_x, (T, N, C, H, W), dtype=jnp.float32)

    # Deterministic parameter init (Conv2d kaiming-uniform-ish range; BN defaults).
    fan_in = C  # 1x1 conv: C_in * 1 * 1
    bound = 1.0 / jnp.sqrt(fan_in)
    conv_w = jax.random.uniform(k_w, (C, C, 1, 1), minval=-bound, maxval=bound,
                                dtype=jnp.float32)
    bn_gamma = jnp.ones((C,), dtype=jnp.float32)
    bn_beta = jnp.zeros((C,), dtype=jnp.float32)

    out = transform_forward(x, conv_w, bn_gamma, bn_beta)
    jax.block_until_ready(out)

    # Pure-JAX reference with identical semantics.
    xm = jnp.mean(x, axis=0)                                            # [N, C, H, W]
    yr = jnp.einsum('nchw,oc->nohw', xm, conv_w[:, :, 0, 0])            # 1x1 conv
    mu_r = jnp.mean(yr, axis=(0, 2, 3), keepdims=True)
    var_r = jnp.mean((yr - mu_r) ** 2, axis=(0, 2, 3), keepdims=True)
    ref = (yr - mu_r) * jax.lax.rsqrt(var_r + BN_EPS) * bn_gamma.reshape(1, C, 1, 1) \
          + bn_beta.reshape(1, C, 1, 1)
    tol = 1e-4 if _Y_DTYPE == jnp.float32 else 2e-3
    assert jnp.allclose(out, ref, atol=tol, rtol=tol), "mismatch vs reference"

    print("KERNEL_OK")
</pallas_src>

<mosaic_0001>
module attributes {stable_mosaic.version = 11 : i64} {
  func.func @_pass1_kernel(%arg0: i32, %arg1: i32, %arg2: i32, %arg3: memref<1x1x4x256xf32, #tpu.memory_space<vmem>>, %arg4: memref<4x4x1xf32, #tpu.memory_space<vmem>>, %arg5: memref<1x4x256xf32, #tpu.memory_space<vmem>>, %arg6: memref<1x1x4x1xf32, #tpu.memory_space<vmem>>, %arg7: memref<1x1x4x1xf32, #tpu.memory_space<vmem>>, %arg8: memref<4x256xf32, #tpu.memory_space<vmem>>) attributes {dimension_semantics = [#tpu.dimension_semantics<parallel>, #tpu.dimension_semantics<parallel>, #tpu.dimension_semantics<arbitrary>], iteration_bounds = array<i64: 2, 1, 4>, scalar_prefetch = 0 : i64, scratch_operands = 1 : i64, tpu.core_type = #tpu.core_type<tc>, window_params = [{transform_indices = @transform_0, window_bounds = array<i64: 1, 1, 4, 256>}, {pipeline_mode = #tpu.pipeline_mode<synchronous>, transform_indices = @transform_1, window_bounds = array<i64: 4, 4, 1>}, {transform_indices = @transform_2, window_bounds = array<i64: 1, 4, 256>}, {transform_indices = @transform_3, window_bounds = array<i64: 1, 1, 4, 1>}, {transform_indices = @transform_4, window_bounds = array<i64: 1, 1, 4, 1>}]} {
    %c0_i32 = arith.constant 0 : i32
    %0 = arith.cmpi eq, %arg2, %c0_i32 : i32
    %1 = arith.extui %0 : i1 to i32
    %c0_i32_0 = arith.constant 0 : i32
    %2 = arith.cmpi ne, %1, %c0_i32_0 : i32
    scf.if %2 {
      %cst = arith.constant 0.000000e+00 : f32
      %11 = vector.broadcast %cst : f32 to vector<4x256xf32>
      %c0_9 = arith.constant 0 : index
      %c0_10 = arith.constant 0 : index
      %12 = vector.load %arg8[%c0_9, %c0_10] : memref<4x256xf32, #tpu.memory_space<vmem>>, vector<4x256xf32>
      tpu.vector_store %arg8[%c0_9, %c0_10], %11 {strides = array<i32>} : memref<4x256xf32, #tpu.memory_space<vmem>>, vector<4x256xf32>,
    } else {
    }
    %c0 = arith.constant 0 : index
    %c0_1 = arith.constant 0 : index
    %3 = vector.load %arg8[%c0, %c0_1] : memref<4x256xf32, #tpu.memory_space<vmem>>, vector<4x256xf32>
    %c0_2 = arith.constant 0 : index
    %c0_3 = arith.constant 0 : index
    %c0_4 = arith.constant 0 : index
    %c0_5 = arith.constant 0 : index
    %4 = vector.load %arg3[%c0_2, %c0_3, %c0_4, %c0_5] : memref<1x1x4x256xf32, #tpu.memory_space<vmem>>, vector<1x1x4x256xf32>
    %5 = vector.shape_cast %4 : vector<1x1x4x256xf32> to vector<4x256xf32>
    %6 = arith.addf %3, %5 : vector<4x256xf32>
    %c0_6 = arith.constant 0 : index
    %c0_7 = arith.constant 0 : index
    %7 = vector.load %arg8[%c0_6, %c0_7] : memref<4x256xf32, #tpu.memory_space<vmem>>, vector<4x256xf32>
    tpu.vector_store %arg8[%c0_6, %c0_7], %6 {strides = array<i32>} : memref<4x256xf32, #tpu.memory_space<vmem>>, vector<4x256xf32>,
    %c3_i32 = arith.constant 3 : i32
    %8 = arith.cmpi eq, %arg2, %c3_i32 : i32
    %9 = arith.extui %8 : i1 to i32
    %c0_i32_8 = arith.constant 0 : i32
    %10 = arith.cmpi ne, %9, %c0_i32_8 : i32
    scf.if %10 {
      %c0_9 = arith.constant 0 : index
      %c0_10 = arith.constant 0 : index
      %11 = vector.load %arg8[%c0_9, %c0_10] : memref<4x256xf32, #tpu.memory_space<vmem>>, vector<4x256xf32>
      %c0_11 = arith.constant 0 : index
      %c0_12 = arith.constant 0 : index
      %c0_13 = arith.constant 0 : index
      %12 = vector.load %arg4[%c0_11, %c0_12, %c0_13] : memref<4x4x1xf32, #tpu.memory_space<vmem>>, vector<1x4x1xf32>
      %13 = vector.shape_cast %12 : vector<1x4x1xf32> to vector<4x1xf32>
      %14 = vector.extract_strided_slice %11 {offsets = [0, 0], sizes = [1, 256], strides = [1, 1]} : vector<4x256xf32> to vector<1x256xf32>
      %15 = vector.broadcast %13 : vector<4x1xf32> to vector<4x256xf32>
      %16 = vector.broadcast %14 : vector<1x256xf32> to vector<4x256xf32>
      %17 = arith.mulf %15, %16 : vector<4x256xf32>
      %c1 = arith.constant 1 : index
      %c0_14 = arith.constant 0 : index
      %c0_15 = arith.constant 0 : index
      %18 = vector.load %arg4[%c1, %c0_14, %c0_15] : memref<4x4x1xf32, #tpu.memory_space<vmem>>, vector<1x4x1xf32>
      %19 = vector.shape_cast %18 : vector<1x4x1xf32> to vector<4x1xf32>
      %20 = vector.extract_strided_slice %11 {offsets = [1, 0], sizes = [1, 256], strides = [1, 1]} : vector<4x256xf32> to vector<1x256xf32>
      %21 = vector.broadcast %19 : vector<4x1xf32> to vector<4x256xf32>
      %22 = vector.broadcast %20 : vector<1x256xf32> to vector<4x256xf32>
      %23 = arith.mulf %21, %22 : vector<4x256xf32>
      %24 = arith.addf %17, %23 : vector<4x256xf32>
      %c2 = arith.constant 2 : index
      %c0_16 = arith.constant 0 : index
      %c0_17 = arith.constant 0 : index
      %25 = vector.load %arg4[%c2, %c0_16, %c0_17] : memref<4x4x1xf32, #tpu.memory_space<vmem>>, vector<1x4x1xf32>
      %26 = vector.shape_cast %25 : vector<1x4x1xf32> to vector<4x1xf32>
      %27 = vector.extract_strided_slice %11 {offsets = [2, 0], sizes = [1, 256], strides = [1, 1]} : vector<4x256xf32> to vector<1x256xf32>
      %28 = vector.broadcast %26 : vector<4x1xf32> to vector<4x256xf32>
      %29 = vector.broadcast %27 : vector<1x256xf32> to vector<4x256xf32>
      %30 = arith.mulf %28, %29 : vector<4x256xf32>
      %31 = arith.addf %24, %30 : vector<4x256xf32>
      %c3 = arith.constant 3 : index
      %c0_18 = arith.constant 0 : index
      %c0_19 = arith.constant 0 : index
      %32 = vector.load %arg4[%c3, %c0_18, %c0_19] : memref<4x4x1xf32, #tpu.memory_space<vmem>>, vector<1x4x1xf32>
      %33 = vector.shape_cast %32 : vector<1x4x1xf32> to vector<4x1xf32>
      %34 = vector.extract_strided_slice %11 {offsets = [3, 0], sizes = [1, 256], strides = [1, 1]} : vector<4x256xf32> to vector<1x256xf32>
      %35 = vector.broadcast %33 : vector<4x1xf32> to vector<4x256xf32>
      %36 = vector.broadcast %34 : vector<1x256xf32> to vector<4x256xf32>
      %37 = arith.mulf %35, %36 : vector<4x256xf32>
      %38 = arith.addf %31, %37 : vector<4x256xf32>
      %c0_20 = arith.constant 0 : index
      %c0_21 = arith.constant 0 : index
      %c0_22 = arith.constant 0 : index
      %39 = vector.load %arg5[%c0_20, %c0_21, %c0_22] : memref<1x4x256xf32, #tpu.memory_space<vmem>>, vector<1x4x256xf32>
      %40 = vector.shape_cast %39 : vector<1x4x256xf32> to vector<4x256xf32>
      %41 = vector.shape_cast %38 : vector<4x256xf32> to vector<1x4x256xf32>
      tpu.vector_store %arg5[%c0_20, %c0_21, %c0_22], %41 {strides = array<i32>} : memref<1x4x256xf32, #tpu.memory_space<vmem>>, vector<1x4x256xf32>,
      %cst = arith.constant dense<0.000000e+00> : vector<4xf32>
      %42 = vector.multi_reduction <add>, %38, %cst [1] : vector<4x256xf32> to vector<4xf32>
      %43 = vector.shape_cast %42 : vector<4xf32> to vector<4x1xf32>
      %c0_23 = arith.constant 0 : index
      %c0_24 = arith.constant 0 : index
      %c0_25 = arith.constant 0 : index
      %c0_26 = arith.constant 0 : index
      %44 = vector.load %arg6[%c0_23, %c0_24, %c0_25, %c0_26] : memref<1x1x4x1xf32, #tpu.memory_space<vmem>>, vector<1x1x4x1xf32>
      %45 = vector.shape_cast %44 : vector<1x1x4x1xf32> to vector<4x1xf32>
      %46 = vector.shape_cast %43 : vector<4x1xf32> to vector<1x1x4x1xf32>
      tpu.vector_store %arg6[%c0_23, %c0_24, %c0_25, %c0_26], %46 {strides = array<i32>} : memref<1x1x4x1xf32, #tpu.memory_space<vmem>>, vector<1x1x4x1xf32>,
      %47 = arith.mulf %38, %38 : vector<4x256xf32>
      %cst_27 = arith.constant dense<0.000000e+00> : vector<4xf32>
      %48 = vector.multi_reduction <add>, %47, %cst_27 [1] : vector<4x256xf32> to vector<4xf32>
      %49 = vector.shape_cast %48 : vector<4xf32> to vector<4x1xf32>
      %c0_28 = arith.constant 0 : index
      %c0_29 = arith.constant 0 : index
      %c0_30 = arith.constant 0 : index
      %c0_31 = arith.constant 0 : index
      %50 = vector.load %arg7[%c0_28, %c0_29, %c0_30, %c0_31] : memref<1x1x4x1xf32, #tpu.memory_space<vmem>>, vector<1x1x4x1xf32>
      %51 = vector.shape_cast %50 : vector<1x1x4x1xf32> to vector<4x1xf32>
      %52 = vector.shape_cast %49 : vector<4x1xf32> to vector<1x1x4x1xf32>
      tpu.vector_store %arg7[%c0_28, %c0_29, %c0_30, %c0_31], %52 {strides = array<i32>} : memref<1x1x4x1xf32, #tpu.memory_space<vmem>>, vector<1x1x4x1xf32>,
    } else {
    }
    return
  }
  func.func @transform_0(%arg0: i32, %arg1: i32, %arg2: i32) -> (i32, i32, i32, i32) {
    %c0_i32 = arith.constant 0 : i32
    %c0_i32_0 = arith.constant 0 : i32
    return %arg2, %arg0, %c0_i32, %arg1 : i32, i32, i32, i32
  }
  func.func @transform_1(%arg0: i32, %arg1: i32, %arg2: i32) -> (i32, i32, i32) {
    %c0_i32 = arith.constant 0 : i32
    %c0_i32_0 = arith.constant 0 : i32
    %c0_i32_1 = arith.constant 0 : i32
    %c0_i32_2 = arith.constant 0 : i32
    return %c0_i32, %c0_i32_0, %c0_i32_1 : i32, i32, i32
  }
  func.func @transform_2(%arg0: i32, %arg1: i32, %arg2: i32) -> (i32, i32, i32) {
    %c0_i32 = arith.constant 0 : i32
    %c0_i32_0 = arith.constant 0 : i32
    return %arg0, %c0_i32, %arg1 : i32, i32, i32
  }
  func.func @transform_3(%arg0: i32, %arg1: i32, %arg2: i32) -> (i32, i32, i32, i32) {
    %c0_i32 = arith.constant 0 : i32
    %c0_i32_0 = arith.constant 0 : i32
    %c0_i32_1 = arith.constant 0 : i32
    return %arg0, %arg1, %c0_i32, %c0_i32_0 : i32, i32, i32, i32
  }
  func.func @transform_4(%arg0: i32, %arg1: i32, %arg2: i32) -> (i32, i32, i32, i32) {
    %c0_i32 = arith.constant 0 : i32
    %c0_i32_0 = arith.constant 0 : i32
    %c0_i32_1 = arith.constant 0 : i32
    return %arg0, %arg1, %c0_i32, %c0_i32_0 : i32, i32, i32, i32
  }
}

</mosaic_0001>

<bundles_post_ra>
// kernel: tpu_custom_call.1
= control target key start
LH: loop header
LB: loop body
LE: loop exit
PB: predicated region body
PF: predicated region fallthrough
CT: control target
= control target key end

     0   :  { %10 = vsyncpa [#allocation4], 0  ;;  %s1150_s0 = inlined_call_operand.hbm [shape: f32[4,2,4,256], index: 0, kind: input, shape index: {}]   ;;  %s1151_s1 = inlined_call_operand.vmem [shape: f32[4,4,1], index: 1, kind: input, shape index: {}]   ;;  %s1152_s2 = inlined_call_operand.hbm [shape: f32[2,4,256], index: 2, kind: output, shape index: {0}]   ;;  %s1153_s3 = inlined_call_operand.vmem [shape: f32[2,1,4,1], index: 3, kind: output, shape index: {1}]   ;;  %s1154_s4 = inlined_call_operand.vmem [shape: f32[2,1,4,1], index: 4, kind: output, shape index: {2}]  }
   0x1   :  { %12 = vsyncpa [#allocation4 + $0x1], 0 }
   0x2   :  { %13 = vsyncpa [#allocation5], 0 }
   0x3   :  { %15 = vsyncpa [#allocation5 + $0x1], 0  ;;  %s931_s15 = smov 0   ;;  %s933_s16 = smov 0  }
   0x4   :  { %s935_s17 = smov 0   ;;  %s937_s18 = smov 0  }
   0x5   :  { %s939_s19 = smov 0   ;;  %s941_s20 = smov 0  }
   0x6   :  { %s943_s21 = smov 0   ;;  %s945_s22 = smov 0  }
   0x7   :  { %s947_s23 = smov 0   ;;  %s949_s24 = smov 0  }
   0x8   :  { %s951_s25 = smov 0  }
   0x9 LB: > { %1158 = sst [smem:[#allocation9_spill]] %s880_s20  ;;  %s622_s26 = sadd.s32 4294967295, %s900_s25   ;;  %s900_s25 = sphi %s951_s25, %s21_s25   ;;  %s896_s24 = sphi %s949_s24, %s1182_s24   ;;  %s892_s23 = sphi %s947_s23, %s1181_s23   ;;  %s888_s22 = sphi %s945_s22, %s1180_s22   ;;  %s884_s21 = sphi %s943_s21, %s1179_s21   ;;  %s880_s20 = sphi %s941_s20, %s1171_s20   ;;  %s876_s19 = sphi %s939_s19, %s1178_s19   ;;  %s872_s18 = sphi %s937_s18, %s1177_s18   ;;  %s868_s17 = sphi %s935_s17, %s1176_s17   ;;  %s864_s16 = sphi %s933_s16, %s1175_s16   ;;  %s860_s15 = sphi %s931_s15, %s1174_s15  }
   0xa   : > { %s623_s27 = sadd.s32 4294967294, %s900_s25   ;;  %s33_s28 = sadd.s32 1, %s892_s23 }
   0xb   : > { %s40_s29 = sadd.s32 1, %s896_s24  ;;  %p34_p0 = scmp.ge.s32.totalorder %s33_s28, 4 }
   0xc   : > { %s51_s30 = sadd.s32 1, %s880_s20  ;;  %p58_p1 = scmp.ne.s32.totalorder %s880_s20, %s876_s19 }
   0xd   : > { %p59_p2 = scmp.eq.s32.totalorder %s900_s25, 0  ;;  %s1184_s28 = smov (%p34_p0, %s33_s28), 0 }
   0xe   : > { %1159 = sst [smem:[#allocation10_spill]] %s1184_s28  ;;  %s1186_s29 = smov (!%p34_p0, %s40_s29), %s896_s24 }
   0xf   : > { %s44_s5 = ssub.s32 %s892_s23, %s1184_s28  ;;  %p997_p3 = por %p59_p2, %p58_p1 }
  0x10   : > { %p42_p4 = scmp.ge.s32.totalorder %s1186_s29, 2  ;;  %p64_p5 = scmp.ne.s32.totalorder %s876_s19, %s872_s18 }
  0x11   : > { %p65_p6 = scmp.eq.s32.totalorder %s622_s26, 0  ;;  %s100_s7 = sadd.s32 1, %s868_s17 }
  0x12   : > { %s1188_s29 = smov (%p42_p4, %s1186_s29), 0  ;;  %p110_p8 = scmp.ne.s32.totalorder %s868_s17, %s864_s16 }
  0x13   : > { %1161 = sst [smem:[#allocation11_spill]] %s1188_s29  ;;  %p1005_p7 = por %p65_p6, %p64_p5 }
  0x14   : > { %s45_s9 = ssub.s32 %s896_s24, %s1188_s29  ;;  %p111_p9 = scmp.eq.s32.totalorder %s622_s26, 7 }
  0x15   : > { %s46_s10 = sor.u32 %s45_s9, %s44_s5  ;;  %p98_p10 = scmp.eq.s32.totalorder %s45_s9, 0 }
  0x16   : > { %p49_p11 = scmp.eq.s32.totalorder %s46_s10, 0  ;;  %p1013_p12 = por %p111_p9, %p110_p8 }
  0x17   : > { %s1018_s12 = scalar_select %p98_p10, %s868_s17, %s100_s7  }
  0x18   : > { %s1021_s13 = scalar_select %p49_p11, %s880_s20, %s51_s30  }
  0x19   : > { %1164 = sst [smem:[#allocation12_spill]] %s1018_s12  ;;  %p116_p13 = scmp.ne.s32.totalorder %s864_s16, %s860_s15 }
  0x1a   : > { %1165 = sst [smem:[#allocation13_spill]] %s1021_s13  ;;  %p117_p0 = scmp.eq.s32.totalorder %s623_s27, 7 }
  0x1b   : > { %p658_p1 = scmp.lt.s32.totalorder %s900_s25, 8  ;;  %s196_s18 = sand.u32 1, %s880_s20  }
  0x1c   : > { %p1026_p2 = por %p117_p0, %p116_p13  ;;  %s626_s26 = sshll.u32 %s196_s18, 3 }
  0x1d   : > { %s627_s5 = sshll.u32 %s896_s24, 1  ;;  %s628_s9 = sshll.u32 %s892_s23, 2 }
  0x1e   : > { %s1166_s14 = scalar_select %p1026_p2, 1, 0 }
  0x1f   : > { %s200_s10 = scalar_lea.vmem [#allocation3], %s626_s26  ;;  %s208_s28 = sadd.s32 %s628_s9, %s627_s5 }
  0x20   : > { %s212_s29 = sshll.u32 %s200_s10, 4  ;;  %s629_s7 = sshll.u32 %s208_s28, 6  ;;  %s213_s29 = int_to_ptr.vmem [resolvable:$true] %s212_s29 }
  0x21   : > { %p1035_p4 = pnand %p658_p1, %p997_p3  ;;  %s210_s12 = scalar_lea.hbm %s1150_s0, %s629_s7 }
  0x22   : > { %p630_p5 = scmp.ge.s32.totalorder %s900_s25, 1  ;;  %p217_p6 = scmp.lt.s32.totalorder %s900_s25, 9 }
  0x23   : > { %s197_s20 = scalar_lea.sflag [#allocation4], %s196_s18  ;;  %p754_p8 = pneg %p1035_p4 }
  0x24   : > { %s765_s26 = scalar_lea.vmem %s213_s29, 128  ;;  %s902_s28 = smov [#allocation3]  }
  0x25   : > { %p766_p9 = scmp.ne.s32.totalorder %s213_s29, %s765_s26  ;;  %s770_s6 = sshll.u32 %s902_s28, 4  ;;  %s771_s6 = int_to_ptr.vmem [resolvable:$false] %s770_s6 }
  0x26   : > { %s772_s5 = scalar_lea.vmem %s771_s6, 256  ;;  %p773_p3 = scmp.lt.s32.totalorder %s213_s29, %s771_s6 }
  0x27   : > { %p768_p10 = pnand %p766_p9, %p754_p8  ;;  %p774_p13 = scmp.lt.s32.totalorder %s772_s5, %s765_s26 }
  0x29   : > { %p769_p11 = pneg %p768_p10  ;;  %p775_p0 = por %p774_p13, %p773_p3 }
  0x2b   : > { %p776_p1 = pnand %p775_p0, %p769_p11 }
  0x2d   : > { %779 = shalt.err (!%p776_p1)
}
  0x2e   : > { %653 = dma.hbm_to_vmem [thread:$0]  (!%p1035_p4), %s210_s12, 128, %s213_s29, %s197_s20  }
  0x2f   : > { %p218_p2 = pnand %p630_p5, %p217_p6 }
  0x30   : > { %s223_s13 = sand.u32 (!%p218_p2), 1, %s876_s19  }
  0x31   : > { %221 = sbr.rel (%p218_p2) target bundleno = 381 (0x17d), region = 28  ;;  %s631_s18 = sshll.u32 (!%p218_p2), %s223_s13, 3 }
  0x32   : > { %s224_s9 = scalar_lea.sflag (!%p218_p2), [#allocation4], %s223_s13  ;;  %s227_s10 = scalar_lea.vmem (!%p218_p2), [#allocation3], %s631_s18 }
  0x36   : > { %851 = dma.done.wait (%p1005_p7), %s224_s9, 128  }
  0x37   : > { %853 = vsyncadd (%p1005_p7), %s224_s9, 4294967168  ;;  %s245_s20 = sand.u32 1, %s864_s16   ;;  %p268_p4 = scmp.lt.s32.totalorder %s888_s22, 1 }
  0x38   : > { %s1061_s29 = sshll.u32 %s245_s20, 3  ;;  %p635_p7 = scmp.ne.s32.totalorder %s884_s21, 0 }
  0x39   : > { %s269_s12 = scalar_select %p268_p4, %s888_s22, 1 }
  0x3a   : > { %s247_s5 = scalar_lea.vmem [#allocation6], %s1061_s29  ;;  %285 = sbr.rel (%p635_p7) target bundleno = 65 (0x41), region = 36 }
  0x3b   : > { %s633_s7 = sshll.u32 %s269_s12, 2 }
  0x3c   : > { %s1067_s26 = scalar_lea.vmem %s1153_s3, %s633_s7  ;;  %s1072_s6 = scalar_lea.vmem %s1154_s4, %s633_s7 }
  0x3f   : > { %v903_v0 = vmov 0.0  }
  0x40   : > { %286 = vst [vmem:[#allocation2] sm:$0xff] %v903_v0 }
  0x41 PF: > { %v288_v2 = vld [vmem:[%s227_s10] sm:$0xff]  ;;  %p636_p2 = scmp.ne.s32.totalorder %s884_s21, 3 }
  0x46   : > { %294 = sbr.rel (%p636_p2) target bundleno = 358 (0x166), region = 40 }
  0x47   : > { %v287_v1 = vld [vmem:[#allocation2] sm:$0xff] }
  0x48   : > { %v289_v3 = vadd.f32 %v288_v2, %v287_v1 }
  0x4a   : > { %290 = vst [vmem:[#allocation2] sm:$0xff] %v289_v3 }
  0x4b   : > { %v638_v4 = vld [vmem:[%s1151_s1 + $0x8] sm:$0xf]  ;;  %v296_v5 = vld [vmem:[%s1151_s1] sm:$0xf]  ;;  %v904_v6 = vmov 0   ;;  %v303_v9 = vlaneseq  ;;  %vm415_vm0 = vcmask 1043456  }
  0x4c   : > { %751 = vset.pattern.permute.xlu1 %v904_v6  ;;  %750 = vset.pattern.permute.xlu0 %v904_v6  ;;  %v639_v7 = vld [vmem:[%s1151_s1 + $0xc] sm:$0xf]  ;;  %v637_v8 = vld [vmem:[%s1151_s1 + $0x4] sm:$0xf]  ;;  %vm421_vm1 = vcmask 3072  }
  0x4d   : > { %356 = vperm.xlu1 %751, %v638_v4   ;;  %299 = vperm.xlu0 %750, %v296_v5   ;;  %v304_v10 = vshrl.u32 %v303_v9, 7 }
  0x4f   : > { %v305_v11 = vsub.s32 0, %v304_v10  ;;  %v309_v12 = vsub.s32 4, %v304_v10  ;;  %v332_v13 = vsub.s32 1, %v304_v10  ;;  %v336_v14 = vsub.s32 5, %v304_v10 }
  0x50   : > { %v361_v16 = vsub.s32 2, %v304_v10  ;;  %v365_v17 = vsub.s32 6, %v304_v10  ;;  %v390_v18 = vsub.s32 3, %v304_v10  ;;  %v394_v19 = vsub.s32 7, %v304_v10 }
  0x51   : > { %385 = vperm.xlu1 %751, %v639_v7   ;;  %327 = vperm.xlu0 %750, %v637_v8   ;;  %v295_v15 = vld [vmem:[#allocation2] sm:$0xff] }
  0x52   : > { %v306_v20 = vrot.slane %v295_v15, %v305_v11  ;;  %v310_v21 = vrot.slane %v295_v15, %v309_v12  ;;  %v333_v22 = vrot.slane %v295_v15, %v332_v13  ;;  %v337_v23 = vrot.slane %v295_v15, %v336_v14 }
  0x53   : > { %v362_v24 = vrot.slane %v295_v15, %v361_v16  ;;  %v366_v25 = vrot.slane %v295_v15, %v365_v17  ;;  %v391_v28 = vrot.slane %v295_v15, %v390_v18  ;;  %v395_v29 = vrot.slane %v295_v15, %v394_v19 }
  0x54   : > { %v316_v30 = vrot.slane %v306_v20, %v305_v11  ;;  %v320_v31 = vrot.slane %v310_v21, %v305_v11  ;;  %v343_v32 = vrot.slane %v333_v22, %v332_v13  ;;  %v347_v33 = vrot.slane %v337_v23, %v332_v13 }
  0x55   : > { %v372_v34 = vrot.slane %v362_v24, %v361_v16  ;;  %v376_v35 = vrot.slane %v366_v25, %v361_v16  ;;  %v401_v36 = vrot.slane %v391_v28, %v390_v18  ;;  %v405_v37 = vrot.slane %v395_v29, %v390_v18 }
  0xc8   : > { %v357_v26 = vpop.permute.xlu1 %356  ;;  %v300_v27 = vpop.permute.xlu0 %299 }
  0xc9   : > { %v321_v39 = vmul.f32 %v316_v30, %v300_v27  ;;  %v322_v40 = vmul.f32 %v320_v31, %v300_v27  ;;  %v377_v44 = vmul.f32 %v372_v34, %v357_v26  ;;  %v378_v45 = vmul.f32 %v376_v35, %v357_v26 }
  0xcc   : > { %v328_v38 = vpop.permute.xlu0 %327  ;;  %v386_v43 = vpop.permute.xlu1 %385 }
  0xcd   : > { %v348_v41 = vmul.f32 %v343_v32, %v328_v38  ;;  %v349_v42 = vmul.f32 %v347_v33, %v328_v38  ;;  %v406_v48 = vmul.f32 %v401_v36, %v386_v43  ;;  %v407_v49 = vmul.f32 %v405_v37, %v386_v43 }
  0xcf   : > { %v350_v46 = vadd.f32 %v348_v41, %v321_v39  ;;  %v351_v47 = vadd.f32 %v349_v42, %v322_v40 }
  0xd1   : > { %v379_v50 = vadd.f32 %v377_v44, %v350_v46  ;;  %v380_v51 = vadd.f32 %v378_v45, %v351_v47 }
  0xd3   : > { %v408_v52 = vadd.f32 %v406_v48, %v379_v50  ;;  %v409_v53 = vadd.f32 %v407_v49, %v380_v51 }
  0xd5   : > { %v416_v54 = vsel %vm415_vm0, %v408_v52, 0.0  ;;  %v417_v55 = vsel %vm415_vm0, %v409_v53, 0.0  ;;  %v412_v56 = vcombine.low %v408_v52, %v409_v53  ;;  %v423_v57 = vmul.f32 %v408_v52, %v408_v52 }
  0xd6   : > { %v418_v58 = vadd.f32 %v417_v55, %v416_v54  ;;  %v424_v59 = vmul.f32 %v409_v53, %v409_v53 }
  0xd7   : > { %414 = vst [vmem:[%s247_s5] sm:$0xff] %v412_v56  ;;  %v425_v60 = vsel %vm415_vm0, %v423_v57, 0.0 }
  0xd8   : > { %419 = vadd.xlane.f32.xlu0 %v418_v58  ;;  %v426_v61 = vsel %vm415_vm0, %v424_v59, 0.0 }
  0xd9   : > { %v427_v62 = vadd.f32 %v426_v61, %v425_v60 }
  0xdb   : > { %428 = vadd.xlane.f32.xlu1 %v427_v62 }
 0x161   : > { %v420_v63 = vpop.xlane.xlu0 %419 }
 0x162   : > { %422 = vst.msk [vmem:[%s1067_s26] sm:$0xf] %vm421_vm1, %v420_v63 }
 0x164   : > { %v429_v0 = vpop.xlane.xlu1 %428 }
 0x165   : > { %430 = vst.msk [vmem:[%s1072_s6] sm:$0xf] %vm421_vm1, %v429_v0 }
 0x166 PF: > { %s645_s27 = sshll.u32 %s888_s22, 7  ;;  %s462_s18 = sshll.u32 %s247_s5, 4  ;;  %s463_s18 = int_to_ptr.vmem [resolvable:$true] %s462_s18 }
 0x167   : > { %s460_s13 = scalar_lea.hbm %s1152_s2, %s645_s27  ;;  %s432_s9 = scalar_lea.sflag [#allocation5], %s245_s20 }
 0x168   : > { %s780_s12 = scalar_lea.vmem %s463_s18, 128  ;;  %s905_s26 = smov [#allocation6]  }
 0x169   : > { %p781_p5 = scmp.ne.s32.totalorder %s463_s18, %s780_s12  ;;  %s784_s6 = sshll.u32 %s905_s26, 4  ;;  %s785_s6 = int_to_ptr.vmem [resolvable:$false] %s784_s6 }
 0x16a   : > { %s786_s7 = scalar_lea.vmem %s785_s6, 256  ;;  %p787_p9 = scmp.lt.s32.totalorder %s463_s18, %s785_s6 }
 0x16b   : > { %p782_p6 = pnand %p781_p5, %p1013_p12  ;;  %p788_p10 = scmp.lt.s32.totalorder %s786_s7, %s780_s12 }
 0x16d   : > { %p783_p8 = pneg %p782_p6  ;;  %p789_p11 = por %p788_p10, %p787_p9 }
 0x16f   : > { %p790_p3 = pnand %p789_p11, %p783_p8 }
 0x171   : > { %793 = shalt.err (!%p790_p3)
}
 0x172   : > { %s794_s22 = scalar_lea.hbm %s460_s13, 128  ;;  %s798_s5 = scalar_lea.hbm %s1152_s2, 256 }
 0x173   : > { %p795_p13 = scmp.ne.s32.totalorder %s460_s13, %s794_s22  ;;  %p799_p4 = scmp.lt.s32.totalorder %s460_s13, %s1152_s2 }
 0x174   : > { %p800_p7 = scmp.lt.s32.totalorder %s798_s5, %s794_s22 }
 0x175   : > { %p796_p0 = pnand %p795_p13, %p1013_p12 }
 0x176   : > { %p801_p2 = por %p800_p7, %p799_p4 }
 0x177   : > { %p797_p1 = pneg %p796_p0 }
 0x179   : > { %p802_p5 = pnand %p801_p2, %p797_p1 }
 0x17b   : > { %805 = shalt.err (!%p802_p5)
}
 0x17c   : > { %648 = dma.vmem_to_hbm [thread:$0]  (%p1013_p12), %s463_s18, 128, %s460_s13, %s432_s9  }
 0x17d PF: > { %p659_p6 = scmp.ge.s32.totalorder %s900_s25, 2  ;;  %s480_s21 = sand.u32 1, %s860_s15  }
 0x17e   : > { %p1168_p8 = scmp.ne.s32.totalorder %s1166_s14, 0  ;;  %s481_s27 = scalar_lea.sflag [#allocation5], %s480_s21 }
 0x180   : > { %p655_p9 = pnand %p659_p6, %p1168_p8 }
 0x182   : > { %p656_p10 = pneg %p655_p9 }
 0x184   : > { %855 = dma.done.wait (%p656_p10), %s481_s27, 128  }
 0x185   : > { %857 = vsyncadd (%p656_p10), %s481_s27, 4294967168  ;;  %s21_s25 = sadd.s32 1, %s900_s25   ;;  %s1169_s28 = sld [smem:[#allocation12_spill]] }
 0x186   : > { %p18_p11 = scmp.ge.s32.totalorder %s21_s25, 10   ;;  %s1170_s11 = sld [smem:[#allocation9_spill]] }
 0x187   : > { %s1171_s20 = sld [smem:[#allocation13_spill]]  ;;  %s1174_s15 = smov %s864_s16 }
 0x188   : > { %s1172_s8 = sld [smem:[#allocation10_spill]]  ;;  %s1175_s16 = smov %s868_s17 }
 0x189   : > { %s1173_s13 = sld [smem:[#allocation11_spill]]  ;;  %s1177_s18 = smov %s876_s19 }
 0x18a   : > { %s1179_s21 = smov %s892_s23  ;;  %s1180_s22 = smov %s896_s24 }
 0x18b   : > { %s1176_s17 = smov %s1169_s28  ;;  %20 = sbr.rel (!%p18_p11) target bundleno = 9 (0x9), region = 108 }
 0x18c   : > { %s1178_s19 = smov %s1170_s11 }
 0x18e   : > { %s1181_s23 = smov %s1172_s8 }
 0x18f   : > { %s1182_s24 = smov %s1173_s13 }
 0x190   :  { %506 = vsyncpa [#allocation4], 1 }
 0x191   :  { %508 = vsyncpa [#allocation4 + $0x1], 1 }
 0x192   :  { %509 = vsyncpa [#allocation5], 1 }
 0x193   :  { %511 = vsyncpa [#allocation5 + $0x1], 1 }

</bundles_post_ra>
